<compile_context>
chip_gen: v7x
topology: tpu7x:2x2x1
jax: 0.10.0
libtpu: 0.0.40
codegen_flags: <defaults>
</compile_context>

<pallas_src>
import jax
import jax.numpy as jnp
from jax.experimental import pallas as pl
from jax.experimental.pallas import tpu as pltpu

D = 32          # embed_dim
K = 8           # max number of social neighbors (padded slots per node)
KD = K * D      # 256: lane-dense neighbor-slab width


def _chip_defaults():
    """(default block_n, vmem_limit_bytes, use 128-wide-MXU split) for the local chip."""
    kind = ""
    try:
        kind = jax.devices()[0].device_kind.lower()
    except Exception:
        pass
    mxu_128 = any(t in kind for t in ("v2", "v3", "v4", "v5"))   # pre-v6 MXUs are 128x128
    big_vmem = any(t in kind for t in ("v4", "v5", "v6"))        # 128 MiB VMEM chips
    if big_vmem:
        return 4096, 96 << 20, mxu_128
    # v7x (64 MiB / TensorCore) or unknown chip: conservative settings.
    return 2048, 48 << 20, mxu_128


# --------------------------------- kernels ---------------------------------
def _attend_and_aggregate(h2, e2, u, mb, w3e_ref, exp_ref, wlu_ref, wln_ref, bl_ref,
                          out_ref):
    """Shared tail: per-slot logits -> masked softmax -> weighted sum -> linear1."""
    # (bn, K) logits; att3's bias is pre-folded into the additive mask mb (f32).
    logits = jnp.dot(h2, w3e_ref[...], preferred_element_type=jnp.float32) + mb
    lmax = jnp.max(logits, axis=-1, keepdims=True)
    p = jnp.exp(logits - lmax)
    att = p * pl.reciprocal(jnp.sum(p, axis=-1, keepdims=True), approx=True)   # (bn, K)
    # Broadcast att[n, k] to the D lanes of slot k via a 0/1 selector matmul (exact).
    att_t = jnp.dot(att.astype(jnp.bfloat16), exp_ref[...],
                    preferred_element_type=jnp.float32).astype(jnp.bfloat16)   # (bn, KD)
    hist2 = att_t * e2                                                          # (bn, KD)
    out = (jnp.dot(u, wlu_ref[...], preferred_element_type=jnp.float32)
           + jnp.dot(hist2, wln_ref[...], preferred_element_type=jnp.float32)
           + bl_ref[...])                                                       # (bn, D)
    out_ref[...] = jnp.maximum(out, 0.0).astype(out_ref.dtype)


def social_agg_kernel_fused(e2_ref, u_ref, mb_ref,
                            w1e_ref, w1u_ref, b1_ref, w2e_ref, b2_ref, w3e_ref,
                            exp_ref, wlu_ref, wln_ref, bl_ref, out_ref):
    """v6e/v7x path: keep the block-diagonal contractions at the full 256 MXU width."""
    e2 = e2_ref[...]                     # (bn, KD) bf16 neighbor slab, lane-dense
    u = u_ref[...]                       # (bn, D)  bf16 self embeddings
    mb = mb_ref[...]                     # (bn, K)  f32 additive mask (+ att3 bias)

    h1 = jnp.maximum(
        jnp.dot(e2, w1e_ref[...], preferred_element_type=jnp.float32)
        + jnp.dot(u, w1u_ref[...], preferred_element_type=jnp.float32)
        + b1_ref[...], 0.0).astype(jnp.bfloat16)                               # (bn, KD)
    h2 = jnp.maximum(
        jnp.dot(h1, w2e_ref[...], preferred_element_type=jnp.float32)
        + b2_ref[...], 0.0).astype(jnp.bfloat16)                               # (bn, KD)
    _attend_and_aggregate(h2, e2, u, mb, w3e_ref, exp_ref, wlu_ref, wln_ref, bl_ref,
                          out_ref)


def social_agg_kernel_split(e2_ref, u_ref, mb_ref,
                            w1e_ref, w1u_ref, b1_ref, w2e_ref, b2_ref, w3e_ref,
                            exp_ref, wlu_ref, wln_ref, bl_ref, out_ref):
    """v5e path: 128-wide contractions for the two dominant block-diagonal matmuls.

    Both diagonal 128x128 quadrants of kron(I_8, W) equal kron(I_4, W), so a single
    (128, 128) weight serves both lane halves; the tiled u-term and biases are
    identical in both halves, so they are computed/sliced once at width 128.
    """
    H = KD // 2
    e2 = e2_ref[...]
    u = u_ref[...]
    mb = mb_ref[...]
    w1e = w1e_ref[...]                   # (H, H)
    w2e = w2e_ref[...]                   # (H, H)
    u_term = (jnp.dot(u, w1u_ref[...][:, :H], preferred_element_type=jnp.float32)
              + b1_ref[...][:, :H])      # (bn, H): identical for both halves
    b2h = b2_ref[...][:, :H]
    halves = []
    for s in (0, H):                     # static unroll over the two 128-lane halves
        h1 = jnp.maximum(
            jnp.dot(e2[:, s:s + H], w1e, preferred_element_type=jnp.float32)
            + u_term, 0.0).astype(jnp.bfloat16)
        h2 = jnp.maximum(
            jnp.dot(h1, w2e, preferred_element_type=jnp.float32) + b2h,
            0.0).astype(jnp.bfloat16)
        halves.append(h2)
    h2 = jnp.concatenate(halves, axis=-1)          # 128-lane aligned concat (no shuffle)
    _attend_and_aggregate(h2, e2, u, mb, w3e_ref, exp_ref, wlu_ref, wln_ref, bl_ref,
                          out_ref)


# --------------------------------- wrapper ----------------------------------
def prepare_social_agg_params(params, mxu_128=None):
    """One-time expansion of (att1, att2, att3, linear1) into the kernel weight layout.

    Linear weights are stored as (in, out).  Call once and reuse across batches: the
    kron/tile expansion and the f32->bf16 cast are hoisted out of the per-batch path.
    """
    if mxu_128 is None:
        mxu_128 = _chip_defaults()[2]
    w1, b1, w2, b2, w3, b3, wl, bl = params
    bf = jnp.bfloat16
    nblk = K // 2 if mxu_128 else K                 # block-diag replication per e-matmul
    eye = jnp.eye(nblk, dtype=jnp.float32)
    eye_k = jnp.eye(K, dtype=jnp.float32)
    return dict(
        mxu_128=bool(mxu_128),
        w1e=jnp.kron(eye, w1[:D]).astype(bf),                       # att1, neighbor half
        w1u=jnp.tile(w1[D:], (1, K)).astype(bf),                    # att1, self half (shared over K)
        b1=jnp.tile(b1, (1, K)).astype(jnp.float32),                # (1, KD)
        w2e=jnp.kron(eye, w2).astype(bf),
        b2=jnp.tile(b2, (1, K)).astype(jnp.float32),                # (1, KD)
        w3e=jnp.kron(eye_k, w3).astype(bf),                         # (KD, K) per-slot logits
        expand=jnp.kron(eye_k, jnp.ones((1, D), jnp.float32)).astype(bf),   # (K, KD)
        wlu=wl[:D].astype(bf),                                      # linear1, self half
        wln=jnp.tile(wl[D:], (K, 1)).astype(bf),                    # linear1, neighbor half (sum over k folded)
        bl=bl.astype(jnp.float32),                                  # (1, D)
        b3=b3.astype(jnp.float32).reshape(()),                      # folded into the softmax mask
    )


def social_aggregator_forward(e_u, u_rep, mask, params, block_n=None):
    """Batched Social_Aggregator forward (eval mode; dropout = identity).

    e_u   : (N, K, D) gathered neighbor embeddings (padded slots are ignored via mask)
    u_rep : (N, D)    self embeddings u2e.weight[nodes]
    mask  : (N, K)    1.0 for valid neighbor slots, 0.0 for padding
    params: raw (w1, b1, w2, b2, w3, b3, wl, bl) or prepare_social_agg_params(...)
    """
    prepared = params if isinstance(params, dict) else prepare_social_agg_params(params)
    N = int(u_rep.shape[0])
    default_bn, vmem_limit, _ = _chip_defaults()
    bn = int(block_n) if block_n is not None else default_bn
    bn = min(bn, N)
    if bn < N:
        bn = max(8, (bn // 8) * 8)           # (8, 128) sublane constraint for interior blocks
    grid = (pl.cdiv(N, bn),)                 # ragged last block handled by Pallas (no jnp.pad)

    # Lane-dense bf16 neighbor slab / self embeddings (halves the dominant HBM stream).
    # TODO(synk): fuse the u2e gather into the kernel (PrefetchScalarGridSpec + per-block
    # DMA gather of neigh_idx) so e_u never round-trips through HBM at all.
    e2 = e_u.reshape(N, KD).astype(jnp.bfloat16)
    u_b = u_rep.astype(jnp.bfloat16)
    # Additive softmax mask; att3's bias is folded in (softmax is shift-invariant).
    mb = (mask.astype(jnp.float32) - 1.0) * 1e30 + prepared["b3"]

    weights = (prepared["w1e"], prepared["w1u"], prepared["b1"], prepared["w2e"],
               prepared["b2"], prepared["w3e"], prepared["expand"], prepared["wlu"],
               prepared["wln"], prepared["bl"])
    kernel = social_agg_kernel_split if prepared["mxu_128"] else social_agg_kernel_fused

    node_spec = lambda w: pl.BlockSpec((bn, w), lambda i: (i, 0))
    const_spec = lambda a: pl.BlockSpec(a.shape, lambda i: (0, 0))   # VMEM-resident weights

    macs = 2 * KD * KD + D * KD + KD * K + K * KD + KD * D + D * D   # per node
    cost = pl.CostEstimate(
        flops=2 * macs * N,
        transcendentals=K * N,
        bytes_accessed=N * (2 * KD + 2 * D + 4 * K + 4 * D)
        + sum(int(w.size) * w.dtype.itemsize for w in weights))

    out = pl.pallas_call(
        kernel,
        out_shape=jax.ShapeDtypeStruct((N, D), jnp.float32),
        grid=grid,
        in_specs=[node_spec(KD), node_spec(D), node_spec(K)]
                 + [const_spec(w) for w in weights],
        out_specs=pl.BlockSpec((bn, D), lambda i: (i, 0)),
        compiler_params=pltpu.CompilerParams(
            dimension_semantics=("parallel",),        # node blocks shard across TCs
            vmem_limit_bytes=vmem_limit),
        cost_estimate=cost,
    )(e2, u_b, mb, *weights)
    return out


# ----------------------- pure-JAX reference (PyTorch semantics) -----------------------
def reference_forward(e_u, u_rep, mask, params):
    w1, b1, w2, b2, w3, b3, wl, bl = params
    N_, K_, _ = e_u.shape
    ub = jnp.broadcast_to(u_rep[:, None, :], (N_, K_, D))
    x = jnp.concatenate([e_u, ub], axis=-1)                    # cat(neighbor, self)
    h1 = jax.nn.relu(jnp.einsum('nkf,fd->nkd', x, w1) + b1)
    h2 = jax.nn.relu(jnp.einsum('nkd,de->nke', h1, w2) + b2)
    logits = jnp.einsum('nkd,do->nko', h2, w3) + b3            # (N, K, 1)
    logits = jnp.where(mask[..., None] > 0.0, logits, -1e30)
    att = jax.nn.softmax(logits, axis=1)                       # softmax over neighbors
    att_hist = jnp.sum(att * e_u, axis=1)                      # (N, D)
    combined = jnp.concatenate([u_rep, att_hist], axis=-1)     # cat(self, neighbor)
    return jax.nn.relu(combined @ wl + bl)


def init_linear(key, fan_in, fan_out):
    """Deterministic PyTorch-style Linear init, stored as (in, out)."""
    kw, kb = jax.random.split(key)
    bound = 1.0 / (fan_in ** 0.5)
    w = jax.random.uniform(kw, (fan_in, fan_out), jnp.float32, -bound, bound)
    b = jax.random.uniform(kb, (1, fan_out), jnp.float32, -bound, bound)
    return w, b


def build_inputs(u2e_weight, nodes, neigh_lists):
    """Host-side equivalent of the social_neighbor lookup + u2e indexing (padded to K)."""
    idx = [list(lst[:K]) + [0] * (K - len(lst[:K])) for lst in neigh_lists]
    msk = [[1.0] * len(lst[:K]) + [0.0] * (K - len(lst[:K])) for lst in neigh_lists]
    neigh_idx = jnp.array(idx, dtype=jnp.int32)                # (N, K)
    mask = jnp.array(msk, dtype=jnp.float32)                   # (N, K)
    e_u = u2e_weight[neigh_idx]                                # (N, K, D)
    u_rep = u2e_weight[jnp.asarray(nodes, dtype=jnp.int32)]    # (N, D)
    return e_u, u_rep, mask


if __name__ == "__main__":
    key = jax.random.PRNGKey(0)
    k_emb, k1, k2, k3, kl, kn = jax.random.split(key, 6)

    num_users = 20
    u2e_weight = jax.random.normal(k_emb, (num_users, D), jnp.float32)

    w1, b1 = init_linear(k1, 2 * D, D)       # att1
    w2, b2 = init_linear(k2, D, D)           # att2
    w3, b3 = init_linear(k3, D, 1)           # att3
    wl, bl = init_linear(kl, 2 * D, D)       # linear1  (Attention.bilinear is unused)
    params = (w1, b1, w2, b2, w3, b3, wl, bl)

    prep_auto = prepare_social_agg_params(params)                  # chip-detected layout
    prep_split = prepare_social_agg_params(params, mxu_128=True)   # v5e 128-MXU layout

    def check(out, ref, tag):
        assert out.shape == ref.shape, tag
        err = float(jnp.max(jnp.abs(out - ref)))
        assert jnp.allclose(out, ref, atol=6e-2, rtol=6e-2), f"{tag}: max|err|={err}"

    # --- case 1: tiny batch -> single block, chip-default block_n / kernel variant ---
    nodes = [3, 7, 1, 12]
    neigh_lists = [
        [0, 2, 5, 9, 11, 14, 17, 19],   # 8 neighbors
        [4, 6, 8, 10, 13],              # 5 neighbors
        [15, 16, 18],                   # 3 neighbors
        [1, 3, 5, 7, 9, 11, 13],        # 7 neighbors
    ]
    e_u, u_rep, mask = build_inputs(u2e_weight, nodes, neigh_lists)
    out1 = jax.block_until_ready(social_aggregator_forward(e_u, u_rep, mask, prep_auto))
    check(out1, reference_forward(e_u, u_rep, mask, params), "case1")

    # --- case 2: multi-block grid with a ragged last block (N=20, bn=8 -> 3 blocks) ---
    nodes2 = list(range(20))
    lens2 = jax.random.randint(kn, (20,), 1, K + 1).tolist()
    neigh_lists2 = [[(3 * i + j) % num_users for j in range(l)] for i, l in enumerate(lens2)]
    e_u2, u_rep2, mask2 = build_inputs(u2e_weight, nodes2, neigh_lists2)
    ref2 = reference_forward(e_u2, u_rep2, mask2, params)

    out2 = jax.block_until_ready(
        social_aggregator_forward(e_u2, u_rep2, mask2, prep_auto, block_n=8))
    check(out2, ref2, "case2-auto")

    # Same batch through the v5e 128-wide-MXU split kernel (correctness parity).
    out3 = jax.block_until_ready(
        social_aggregator_forward(e_u2, u_rep2, mask2, prep_split, block_n=8))
    check(out3, ref2, "case2-split")

    print("KERNEL_OK")
</pallas_src>

<mosaic_0001>
module attributes {stable_mosaic.version = 11 : i64} {
  func.func @social_agg_kernel_fused(%arg0: i32, %arg1: memref<4x256xbf16, #tpu.memory_space<vmem>>, %arg2: memref<4x32xbf16, #tpu.memory_space<vmem>>, %arg3: memref<4x8xf32, #tpu.memory_space<vmem>>, %arg4: memref<256x256xbf16, #tpu.memory_space<vmem>>, %arg5: memref<32x256xbf16, #tpu.memory_space<vmem>>, %arg6: memref<1x256xf32, #tpu.memory_space<vmem>>, %arg7: memref<256x256xbf16, #tpu.memory_space<vmem>>, %arg8: memref<1x256xf32, #tpu.memory_space<vmem>>, %arg9: memref<256x8xbf16, #tpu.memory_space<vmem>>, %arg10: memref<8x256xbf16, #tpu.memory_space<vmem>>, %arg11: memref<32x32xbf16, #tpu.memory_space<vmem>>, %arg12: memref<256x32xbf16, #tpu.memory_space<vmem>>, %arg13: memref<1x32xf32, #tpu.memory_space<vmem>>, %arg14: memref<4x32xf32, #tpu.memory_space<vmem>>) attributes {dimension_semantics = [#tpu.dimension_semantics<parallel>], iteration_bounds = array<i64: 1>, scalar_prefetch = 0 : i64, scratch_operands = 0 : i64, tpu.core_type = #tpu.core_type<tc>, window_params = [{transform_indices = @transform_0, window_bounds = array<i64: 4, 256>}, {transform_indices = @transform_1, window_bounds = array<i64: 4, 32>}, {transform_indices = @transform_2, window_bounds = array<i64: 4, 8>}, {pipeline_mode = #tpu.pipeline_mode<synchronous>, transform_indices = @transform_3, window_bounds = array<i64: 256, 256>}, {pipeline_mode = #tpu.pipeline_mode<synchronous>, transform_indices = @transform_4, window_bounds = array<i64: 32, 256>}, {pipeline_mode = #tpu.pipeline_mode<synchronous>, transform_indices = @transform_5, window_bounds = array<i64: 1, 256>}, {pipeline_mode = #tpu.pipeline_mode<synchronous>, transform_indices = @transform_6, window_bounds = array<i64: 256, 256>}, {pipeline_mode = #tpu.pipeline_mode<synchronous>, transform_indices = @transform_7, window_bounds = array<i64: 1, 256>}, {pipeline_mode = #tpu.pipeline_mode<synchronous>, transform_indices = @transform_8, window_bounds = array<i64: 256, 8>}, {pipeline_mode = #tpu.pipeline_mode<synchronous>, transform_indices = @transform_9, window_bounds = array<i64: 8, 256>}, {pipeline_mode = #tpu.pipeline_mode<synchronous>, transform_indices = @transform_10, window_bounds = array<i64: 32, 32>}, {pipeline_mode = #tpu.pipeline_mode<synchronous>, transform_indices = @transform_11, window_bounds = array<i64: 256, 32>}, {pipeline_mode = #tpu.pipeline_mode<synchronous>, transform_indices = @transform_12, window_bounds = array<i64: 1, 32>}, {transform_indices = @transform_13, window_bounds = array<i64: 4, 32>}]} {
    %c0 = arith.constant 0 : index
    %c0_0 = arith.constant 0 : index
    %0 = vector.load %arg1[%c0, %c0_0] : memref<4x256xbf16, #tpu.memory_space<vmem>>, vector<4x256xbf16>
    %c0_1 = arith.constant 0 : index
    %c0_2 = arith.constant 0 : index
    %1 = vector.load %arg2[%c0_1, %c0_2] : memref<4x32xbf16, #tpu.memory_space<vmem>>, vector<4x32xbf16>
    %c0_3 = arith.constant 0 : index
    %c0_4 = arith.constant 0 : index
    %2 = vector.load %arg3[%c0_3, %c0_4] : memref<4x8xf32, #tpu.memory_space<vmem>>, vector<4x8xf32>
    %c0_5 = arith.constant 0 : index
    %c0_6 = arith.constant 0 : index
    %3 = vector.load %arg4[%c0_5, %c0_6] : memref<256x256xbf16, #tpu.memory_space<vmem>>, vector<256x256xbf16>
    %cst = arith.constant dense<0.000000e+00> : vector<4x256xf32>
    %4 = tpu.matmul %0, %3, %cst {dimension_numbers = #tpu.dot_dimension_numbers<[1], [0], [0], [1], [0, 0, 1, 1], [], []>} : vector<4x256xbf16>, vector<256x256xbf16>, vector<4x256xf32> -> vector<4x256xf32>
    %c0_7 = arith.constant 0 : index
    %c0_8 = arith.constant 0 : index
    %5 = vector.load %arg5[%c0_7, %c0_8] : memref<32x256xbf16, #tpu.memory_space<vmem>>, vector<32x256xbf16>
    %cst_9 = arith.constant dense<0.000000e+00> : vector<4x256xf32>
    %6 = tpu.matmul %1, %5, %cst_9 {dimension_numbers = #tpu.dot_dimension_numbers<[1], [0], [0], [1], [0, 0, 1, 1], [], []>} : vector<4x32xbf16>, vector<32x256xbf16>, vector<4x256xf32> -> vector<4x256xf32>
    %7 = arith.addf %4, %6 : vector<4x256xf32>
    %c0_10 = arith.constant 0 : index
    %c0_11 = arith.constant 0 : index
    %8 = vector.load %arg6[%c0_10, %c0_11] : memref<1x256xf32, #tpu.memory_space<vmem>>, vector<1x256xf32>
    %9 = vector.broadcast %8 : vector<1x256xf32> to vector<4x256xf32>
    %10 = arith.addf %7, %9 : vector<4x256xf32>
    %cst_12 = arith.constant 0.000000e+00 : f32
    %11 = vector.broadcast %cst_12 : f32 to vector<4x256xf32>
    %12 = arith.maximumf %10, %11 : vector<4x256xf32>
    %13 = arith.truncf %12 : vector<4x256xf32> to vector<4x256xbf16>
    %c0_13 = arith.constant 0 : index
    %c0_14 = arith.constant 0 : index
    %14 = vector.load %arg7[%c0_13, %c0_14] : memref<256x256xbf16, #tpu.memory_space<vmem>>, vector<256x256xbf16>
    %cst_15 = arith.constant dense<0.000000e+00> : vector<4x256xf32>
    %15 = tpu.matmul %13, %14, %cst_15 {dimension_numbers = #tpu.dot_dimension_numbers<[1], [0], [0], [1], [0, 0, 1, 1], [], []>} : vector<4x256xbf16>, vector<256x256xbf16>, vector<4x256xf32> -> vector<4x256xf32>
    %c0_16 = arith.constant 0 : index
    %c0_17 = arith.constant 0 : index
    %16 = vector.load %arg8[%c0_16, %c0_17] : memref<1x256xf32, #tpu.memory_space<vmem>>, vector<1x256xf32>
    %17 = vector.broadcast %16 : vector<1x256xf32> to vector<4x256xf32>
    %18 = arith.addf %15, %17 : vector<4x256xf32>
    %cst_18 = arith.constant 0.000000e+00 : f32
    %19 = vector.broadcast %cst_18 : f32 to vector<4x256xf32>
    %20 = arith.maximumf %18, %19 : vector<4x256xf32>
    %21 = arith.truncf %20 : vector<4x256xf32> to vector<4x256xbf16>
    %c0_19 = arith.constant 0 : index
    %c0_20 = arith.constant 0 : index
    %22 = vector.load %arg9[%c0_19, %c0_20] : memref<256x8xbf16, #tpu.memory_space<vmem>>, vector<256x8xbf16>
    %cst_21 = arith.constant dense<0.000000e+00> : vector<4x8xf32>
    %23 = tpu.matmul %21, %22, %cst_21 {dimension_numbers = #tpu.dot_dimension_numbers<[1], [0], [0], [1], [0, 0, 1, 1], [], []>} : vector<4x256xbf16>, vector<256x8xbf16>, vector<4x8xf32> -> vector<4x8xf32>
    %24 = arith.addf %23, %2 : vector<4x8xf32>
    %cst_22 = arith.constant dense<0xFF800000> : vector<4xf32>
    %25 = vector.multi_reduction <maximumf>, %24, %cst_22 [1] : vector<4x8xf32> to vector<4xf32>
    %26 = vector.shape_cast %25 : vector<4xf32> to vector<4x1xf32>
    %27 = vector.broadcast %26 : vector<4x1xf32> to vector<4x8xf32>
    %28 = arith.subf %24, %27 : vector<4x8xf32>
    %29 = math.exp %28 : vector<4x8xf32>
    %cst_23 = arith.constant dense<0.000000e+00> : vector<4xf32>
    %30 = vector.multi_reduction <add>, %29, %cst_23 [1] : vector<4x8xf32> to vector<4xf32>
    %31 = vector.shape_cast %30 : vector<4xf32> to vector<4x1xf32>
    %32 = tpu.reciprocal %31 {approx = true} : vector<4x1xf32> -> vector<4x1xf32>
    %33 = vector.broadcast %32 : vector<4x1xf32> to vector<4x8xf32>
    %34 = arith.mulf %29, %33 : vector<4x8xf32>
    %35 = arith.truncf %34 : vector<4x8xf32> to vector<4x8xbf16>
    %c0_24 = arith.constant 0 : index
    %c0_25 = arith.constant 0 : index
    %36 = vector.load %arg10[%c0_24, %c0_25] : memref<8x256xbf16, #tpu.memory_space<vmem>>, vector<8x256xbf16>
    %cst_26 = arith.constant dense<0.000000e+00> : vector<4x256xf32>
    %37 = tpu.matmul %35, %36, %cst_26 {dimension_numbers = #tpu.dot_dimension_numbers<[1], [0], [0], [1], [0, 0, 1, 1], [], []>} : vector<4x8xbf16>, vector<8x256xbf16>, vector<4x256xf32> -> vector<4x256xf32>
    %38 = arith.truncf %37 : vector<4x256xf32> to vector<4x256xbf16>
    %39 = arith.mulf %38, %0 : vector<4x256xbf16>
    %c0_27 = arith.constant 0 : index
    %c0_28 = arith.constant 0 : index
    %40 = vector.load %arg11[%c0_27, %c0_28] : memref<32x32xbf16, #tpu.memory_space<vmem>>, vector<32x32xbf16>
    %cst_29 = arith.constant dense<0.000000e+00> : vector<4x32xf32>
    %41 = tpu.matmul %1, %40, %cst_29 {dimension_numbers = #tpu.dot_dimension_numbers<[1], [0], [0], [1], [0, 0, 1, 1], [], []>} : vector<4x32xbf16>, vector<32x32xbf16>, vector<4x32xf32> -> vector<4x32xf32>
    %c0_30 = arith.constant 0 : index
    %c0_31 = arith.constant 0 : index
    %42 = vector.load %arg12[%c0_30, %c0_31] : memref<256x32xbf16, #tpu.memory_space<vmem>>, vector<256x32xbf16>
    %cst_32 = arith.constant dense<0.000000e+00> : vector<4x32xf32>
    %43 = tpu.matmul %39, %42, %cst_32 {dimension_numbers = #tpu.dot_dimension_numbers<[1], [0], [0], [1], [0, 0, 1, 1], [], []>} : vector<4x256xbf16>, vector<256x32xbf16>, vector<4x32xf32> -> vector<4x32xf32>
    %44 = arith.addf %41, %43 : vector<4x32xf32>
    %c0_33 = arith.constant 0 : index
    %c0_34 = arith.constant 0 : index
    %45 = vector.load %arg13[%c0_33, %c0_34] : memref<1x32xf32, #tpu.memory_space<vmem>>, vector<1x32xf32>
    %46 = vector.broadcast %45 : vector<1x32xf32> to vector<4x32xf32>
    %47 = arith.addf %44, %46 : vector<4x32xf32>
    %cst_35 = arith.constant 0.000000e+00 : f32
    %48 = vector.broadcast %cst_35 : f32 to vector<4x32xf32>
    %49 = arith.maximumf %47, %48 : vector<4x32xf32>
    %c0_36 = arith.constant 0 : index
    %c0_37 = arith.constant 0 : index
    %50 = vector.load %arg14[%c0_36, %c0_37] : memref<4x32xf32, #tpu.memory_space<vmem>>, vector<4x32xf32>
    tpu.vector_store %arg14[%c0_36, %c0_37], %49 {strides = array<i32>} : memref<4x32xf32, #tpu.memory_space<vmem>>, vector<4x32xf32>,
    return
  }
  func.func @transform_0(%arg0: i32) -> (i32, i32) {
    %c0_i32 = arith.constant 0 : i32
    %c0_i32_0 = arith.constant 0 : i32
    return %arg0, %c0_i32 : i32, i32
  }
  func.func @transform_1(%arg0: i32) -> (i32, i32) {
    %c0_i32 = arith.constant 0 : i32
    %c0_i32_0 = arith.constant 0 : i32
    return %arg0, %c0_i32 : i32, i32
  }
  func.func @transform_2(%arg0: i32) -> (i32, i32) {
    %c0_i32 = arith.constant 0 : i32
    %c0_i32_0 = arith.constant 0 : i32
    return %arg0, %c0_i32 : i32, i32
  }
  func.func @transform_3(%arg0: i32) -> (i32, i32) {
    %c0_i32 = arith.constant 0 : i32
    %c0_i32_0 = arith.constant 0 : i32
    %c0_i32_1 = arith.constant 0 : i32
    return %c0_i32, %c0_i32_0 : i32, i32
  }
  func.func @transform_4(%arg0: i32) -> (i32, i32) {
    %c0_i32 = arith.constant 0 : i32
    %c0_i32_0 = arith.constant 0 : i32
    %c0_i32_1 = arith.constant 0 : i32
    return %c0_i32, %c0_i32_0 : i32, i32
  }
  func.func @transform_5(%arg0: i32) -> (i32, i32) {
    %c0_i32 = arith.constant 0 : i32
    %c0_i32_0 = arith.constant 0 : i32
    %c0_i32_1 = arith.constant 0 : i32
    return %c0_i32, %c0_i32_0 : i32, i32
  }
  func.func @transform_6(%arg0: i32) -> (i32, i32) {
    %c0_i32 = arith.constant 0 : i32
    %c0_i32_0 = arith.constant 0 : i32
    %c0_i32_1 = arith.constant 0 : i32
    return %c0_i32, %c0_i32_0 : i32, i32
  }
  func.func @transform_7(%arg0: i32) -> (i32, i32) {
    %c0_i32 = arith.constant 0 : i32
    %c0_i32_0 = arith.constant 0 : i32
    %c0_i32_1 = arith.constant 0 : i32
    return %c0_i32, %c0_i32_0 : i32, i32
  }
  func.func @transform_8(%arg0: i32) -> (i32, i32) {
    %c0_i32 = arith.constant 0 : i32
    %c0_i32_0 = arith.constant 0 : i32
    %c0_i32_1 = arith.constant 0 : i32
    return %c0_i32, %c0_i32_0 : i32, i32
  }
  func.func @transform_9(%arg0: i32) -> (i32, i32) {
    %c0_i32 = arith.constant 0 : i32
    %c0_i32_0 = arith.constant 0 : i32
    %c0_i32_1 = arith.constant 0 : i32
    return %c0_i32, %c0_i32_0 : i32, i32
  }
  func.func @transform_10(%arg0: i32) -> (i32, i32) {
    %c0_i32 = arith.constant 0 : i32
    %c0_i32_0 = arith.constant 0 : i32
    %c0_i32_1 = arith.constant 0 : i32
    return %c0_i32, %c0_i32_0 : i32, i32
  }
  func.func @transform_11(%arg0: i32) -> (i32, i32) {
    %c0_i32 = arith.constant 0 : i32
    %c0_i32_0 = arith.constant 0 : i32
    %c0_i32_1 = arith.constant 0 : i32
    return %c0_i32, %c0_i32_0 : i32, i32
  }
  func.func @transform_12(%arg0: i32) -> (i32, i32) {
    %c0_i32 = arith.constant 0 : i32
    %c0_i32_0 = arith.constant 0 : i32
    %c0_i32_1 = arith.constant 0 : i32
    return %c0_i32, %c0_i32_0 : i32, i32
  }
  func.func @transform_13(%arg0: i32) -> (i32, i32) {
    %c0_i32 = arith.constant 0 : i32
    %c0_i32_0 = arith.constant 0 : i32
    return %arg0, %c0_i32 : i32, i32
  }
}

</mosaic_0001>

<bundles_post_ra>
// kernel: tpu_custom_call.1
= control target key start
LH: loop header
LB: loop body
LE: loop exit
PB: predicated region body
PF: predicated region fallthrough
CT: control target
= control target key end

     0   :  { %18 = vsyncpa [#allocation3], 0  ;;  %s2080_s0 = inlined_call_operand.hbm [shape: bf16[4,256], index: 0, kind: input, shape index: {}]   ;;  %s2081_s1 = inlined_call_operand.vmem [shape: bf16[4,32], index: 1, kind: input, shape index: {}]   ;;  %s2082_s2 = inlined_call_operand.hbm [shape: f32[4,8], index: 2, kind: input, shape index: {}]   ;;  %s2083_s3 = inlined_call_operand.vmem [shape: bf16[256,256], index: 3, kind: input, shape index: {}]   ;;  %s2084_s4 = inlined_call_operand.hbm [shape: bf16[32,256], index: 4, kind: input, shape index: {}]   ;;  %s2085_s5 = inlined_call_operand.hbm [shape: f32[1,256], index: 5, kind: input, shape index: {}]   ;;  %s2086_s6 = inlined_call_operand.hbm [shape: bf16[256,256], index: 6, kind: input, shape index: {}]   ;;  %s2087_s7 = inlined_call_operand.hbm [shape: f32[1,256], index: 7, kind: input, shape index: {}]   ;;  %s2088_s8 = inlined_call_operand.vmem [shape: bf16[256,8], index: 8, kind: input, shape index: {}]   ;;  %s2089_s9 = inlined_call_operand.vmem [shape: bf16[8,256], index: 9, kind: input, shape index: {}]   ;;  %s2090_s10 = inlined_call_operand.vmem [shape: bf16[32,32], index: 10, kind: input, shape index: {}]   ;;  %s2091_s11 = inlined_call_operand.vmem [shape: bf16[256,32], index: 11, kind: input, shape index: {}]   ;;  %s2092_s12 = inlined_call_operand.vmem [shape: f32[1,32], index: 12, kind: input, shape index: {}]   ;;  %s2093_s13 = inlined_call_operand.hbm [shape: f32[4,32], index: 13, kind: output, shape index: {}]  }
   0x1   :  { %19 = vsyncpa [#allocation6], 0 }
   0x2   :  { %20 = vsyncpa [#allocation9], 0 }
   0x3   :  { %21 = vsyncpa [#allocation12], 0 }
   0x4   :  { %22 = vsyncpa [#allocation4], 0  ;;  %s1682_s25 = smov [#allocation5]   ;;  %s1683_s27 = smov [#allocation8]  }
   0x5   :  { %s41_s26 = sshll.u32 %s1682_s25, 4  ;;  %s65_s28 = sshll.u32 %s1683_s27, 4  ;;  %s42_s26 = int_to_ptr.vmem [resolvable:$true] %s41_s26  ;;  %s66_s28 = int_to_ptr.vmem [resolvable:$true] %s65_s28 }
   0x6   :  { %s1518_s14 = scalar_lea.hbm %s2082_s2, 64 }
   0x7   :  { %p1519_p0 = scmp.ne.s32.totalorder %s2082_s2, %s1518_s14  ;;  %p1522_p1 = scmp.lt.u32.totalorder %s1518_s14, %s2082_s2 }
   0x9   :  { %p1524_p2 = pnand %p1522_p1, %p1519_p0 }
   0xb   :  { %1527 = shalt.err (!%p1524_p2)
}
   0xc   :  { %s1528_s19 = scalar_lea.vmem %s42_s26, 64  ;;  %p1533_p4 = scmp.lt.s32.totalorder %s42_s26, %s42_s26 }
   0xd   :  { %p1529_p3 = scmp.ne.s32.totalorder %s42_s26, %s1528_s19  ;;  %p1534_p5 = scmp.lt.s32.totalorder %s1528_s19, %s1528_s19 }
   0xf   :  { %p1535_p6 = por %p1534_p5, %p1533_p4 }
  0x11   :  { %p1536_p7 = pnand %p1535_p6, %p1529_p3 }
  0x13   :  { %1539 = shalt.err (!%p1536_p7)
}
  0x14   :  { %44 = dma.hbm_to_vmem [thread:$0]  %s2082_s2, 64, %s42_s26, [#allocation6]  }
  0x15   :  { %s1540_s24 = scalar_lea.hbm %s2085_s5, 32 }
  0x16   :  { %p1541_p8 = scmp.ne.s32.totalorder %s2085_s5, %s1540_s24  ;;  %p1544_p9 = scmp.lt.u32.totalorder %s1540_s24, %s2085_s5 }
  0x18   :  { %p1546_p10 = pnand %p1544_p9, %p1541_p8 }
  0x1a   :  { %1549 = shalt.err (!%p1546_p10)
}
  0x1b   :  { %s1550_s14 = scalar_lea.vmem %s66_s28, 32  ;;  %p1555_p12 = scmp.lt.s32.totalorder %s66_s28, %s66_s28 }
  0x1c   :  { %p1551_p11 = scmp.ne.s32.totalorder %s66_s28, %s1550_s14  ;;  %p1556_p13 = scmp.lt.s32.totalorder %s1550_s14, %s1550_s14 }
  0x1e   :  { %p1557_p0 = por %p1556_p13, %p1555_p12 }
  0x20   :  { %p1558_p1 = pnand %p1557_p0, %p1551_p11 }
  0x22   :  { %1561 = shalt.err (!%p1558_p1)
}
  0x23   :  { %68 = dma.hbm_to_vmem [thread:$0]  %s2085_s5, 32, %s66_s28, [#allocation9]  }
  0x24   :  { %s1684_s15 = smov [#allocation2]   ;;  %s1685_s17 = smov [#allocation7]  }
  0x25   :  { %s29_s16 = sshll.u32 %s1684_s15, 4  ;;  %s52_s18 = sshll.u32 %s1685_s17, 4  ;;  %s30_s16 = int_to_ptr.vmem [resolvable:$true] %s29_s16  ;;  %s1788_s18 = int_to_ptr.vmem [resolvable:$true] %s52_s18 }
  0x26   :  { %s1562_s21 = scalar_lea.hbm %s2080_s0, 64 }
  0x27   :  { %p1563_p2 = scmp.ne.s32.totalorder %s2080_s0, %s1562_s21  ;;  %p1566_p3 = scmp.lt.u32.totalorder %s1562_s21, %s2080_s0 }
  0x29   :  { %p1568_p4 = pnand %p1566_p3, %p1563_p2 }
  0x2b   :  { %1571 = shalt.err (!%p1568_p4)
}
  0x2c   :  { %s1572_s5 = scalar_lea.vmem %s30_s16, 64  ;;  %p1577_p6 = scmp.lt.s32.totalorder %s30_s16, %s30_s16 }
  0x2d   :  { %p1573_p5 = scmp.ne.s32.totalorder %s30_s16, %s1572_s5  ;;  %p1578_p7 = scmp.lt.s32.totalorder %s1572_s5, %s1572_s5 }
  0x2f   :  { %p1579_p8 = por %p1578_p7, %p1577_p6 }
  0x31   :  { %p1580_p9 = pnand %p1579_p8, %p1573_p5 }
  0x33   :  { %1583 = shalt.err (!%p1580_p9)
}
  0x34   :  { %32 = dma.hbm_to_vmem [thread:$0]  %s2080_s0, 64, %s30_s16, [#allocation3]  }
  0x35   :  { %s1584_s14 = scalar_lea.hbm %s2084_s4, 512 }
  0x36   :  { %p1585_p10 = scmp.ne.s32.totalorder %s2084_s4, %s1584_s14  ;;  %p1588_p11 = scmp.lt.u32.totalorder %s1584_s14, %s2084_s4 }
  0x38   :  { %p1590_p12 = pnand %p1588_p11, %p1585_p10 }
  0x3a   :  { %1593 = shalt.err (!%p1590_p12)
}
  0x3b   :  { %s1594_s19 = scalar_lea.vmem %s1788_s18, 512  ;;  %p1599_p0 = scmp.lt.s32.totalorder %s1788_s18, %s1788_s18 }
  0x3c   :  { %p1595_p13 = scmp.ne.s32.totalorder %s1788_s18, %s1594_s19  ;;  %p1600_p1 = scmp.lt.s32.totalorder %s1594_s19, %s1594_s19 }
  0x3e   :  { %p1601_p2 = por %p1600_p1, %p1599_p0 }
  0x40   :  { %p1602_p3 = pnand %p1601_p2, %p1595_p13 }
  0x42   :  { %1605 = shalt.err (!%p1602_p3)
}
  0x43   :  { %s1686_s0 = smov 128   ;;  %s1687_s16 = smov 8  }
  0x44   :  { %58 = dma.hbm_to_vmem [thread:$0]  %s2084_s4, 512, %s1788_s18, [#allocation6], %s1686_s0, %s1686_s0, %s1687_s16  }
  0x45   :  { %s1688_s22 = smov [#allocation10]   ;;  %s1689_s24 = smov [#allocation11]  }
  0x46   :  { %s74_s23 = sshll.u32 %s1688_s22, 4  ;;  %s87_s25 = sshll.u32 %s1689_s24, 4  ;;  %s75_s23 = int_to_ptr.vmem [resolvable:$true] %s74_s23  ;;  %s88_s25 = int_to_ptr.vmem [resolvable:$true] %s87_s25 }
  0x47   :  { %s1606_s27 = scalar_lea.hbm %s2086_s6, 4096 }
  0x48   :  { %p1607_p4 = scmp.ne.s32.totalorder %s2086_s6, %s1606_s27  ;;  %p1610_p5 = scmp.lt.u32.totalorder %s1606_s27, %s2086_s6 }
  0x4a   :  { %p1612_p6 = pnand %p1610_p5, %p1607_p4 }
  0x4c   :  { %1615 = shalt.err (!%p1612_p6)
}
  0x4d   :  { %s1616_s4 = scalar_lea.vmem %s75_s23, 4096  ;;  %p1621_p8 = scmp.lt.s32.totalorder %s75_s23, %s75_s23 }
  0x4e   :  { %p1617_p7 = scmp.ne.s32.totalorder %s75_s23, %s1616_s4  ;;  %p1622_p9 = scmp.lt.s32.totalorder %s1616_s4, %s1616_s4 }
  0x50   :  { %p1623_p10 = por %p1622_p9, %p1621_p8 }
  0x52   :  { %p1624_p11 = pnand %p1623_p10, %p1617_p7 }
  0x54   :  { %1627 = shalt.err (!%p1624_p11)
}
  0x55   :  { %80 = dma.hbm_to_vmem [thread:$0]  %s2086_s6, 4096, %s75_s23, [#allocation9], %s1686_s0, %s1686_s0, %s1687_s16  }
  0x56   :  { %s1628_s19 = scalar_lea.hbm %s2087_s7, 32 }
  0x57   :  { %p1629_p12 = scmp.ne.s32.totalorder %s2087_s7, %s1628_s19  ;;  %p1632_p13 = scmp.lt.u32.totalorder %s1628_s19, %s2087_s7 }
  0x59   :  { %p1634_p0 = pnand %p1632_p13, %p1629_p12 }
  0x5b   :  { %1637 = shalt.err (!%p1634_p0)
}
  0x5c   :  { %s1638_s5 = scalar_lea.vmem %s88_s25, 32  ;;  %p1643_p2 = scmp.lt.s32.totalorder %s88_s25, %s88_s25 }
  0x5d   :  { %p1639_p1 = scmp.ne.s32.totalorder %s88_s25, %s1638_s5  ;;  %p1644_p3 = scmp.lt.s32.totalorder %s1638_s5, %s1638_s5 }
  0x5f   :  { %p1645_p4 = por %p1644_p3, %p1643_p2 }
  0x61   :  { %p1646_p5 = pnand %p1645_p4, %p1639_p1 }
  0x63   :  { %1649 = shalt.err (!%p1646_p5)
}
  0x64   :  { %90 = dma.hbm_to_vmem [thread:$0]  %s2087_s7, 32, %s88_s25, [#allocation12]  }
  0x65   :  { %1672 = dma.done.wait [#allocation3], 64  }
  0x66   :  { %1673 = vsyncadd [#allocation3], 4294967232 }
  0x67   :  { %1674 = dma.done.wait [#allocation6], 576  }
  0x68   :  { %1675 = vsyncadd [#allocation6], 4294966720 }
  0x69   :  { %1676 = dma.done.wait [#allocation9], 4128  }
  0x6a   :  { %1677 = vsyncadd [#allocation9], 4294963168 }
  0x6b   :  { %1678 = dma.done.wait [#allocation12], 32  }
  0x6c   :  { %1679 = vsyncadd [#allocation12], 4294967264  ;;  %v1690_v0 = vmov 0   ;;  %v1376_v1 = vld [vmem:[%s2083_s3 + $0x4] ss:$8 sps:$4 sm:$0xff]   ;;  %vm179_vm0 = vcmask 261120  }
  0x6d   :  { %215 = vmatprep.mubr.bf16.mxu0 %v1690_v0  ;;  %v1378_v2 = vld [vmem:[%s2083_s3] ss:$8 sps:$4 sm:$0xff]   ;;  %395 = vmatprep.subr.bf16.mxu1 %v1376_v1  ;;  %v1379_v3 = vld [vmem:[%s2083_s3 + $0x14] ss:$8 sps:$4 sm:$0xff]   ;;  %v1381_v4 = vld [vmem:[%s2083_s3 + $0x10] ss:$8 sps:$4 sm:$0xff]  }
  0x6e   :  { %396 = vmatpush1.bf16.msra.mxu1 %v1378_v2  ;;  %v1382_v5 = vld [vmem:[%s2083_s3 + $0x24] ss:$8 sps:$4 sm:$0xff]   ;;  %v1384_v6 = vld [vmem:[%s2083_s3 + $0x20] ss:$8 sps:$4 sm:$0xff]   ;;  %v1385_v7 = vld [vmem:[%s2083_s3 + $0x34] ss:$8 sps:$4 sm:$0xff]  }
  0x6f   :  { %397 = vmatprep.subr.bf16.mxu1 %v1379_v3  ;;  %v1387_v8 = vld [vmem:[%s2083_s3 + $0x30] ss:$8 sps:$4 sm:$0xff]   ;;  %v1388_v9 = vld [vmem:[%s2083_s3 + $0x44] ss:$8 sps:$4 sm:$0xff]   ;;  %v1390_v10 = vld [vmem:[%s2083_s3 + $0x40] ss:$8 sps:$4 sm:$0xff]  }
  0x70   :  { %v1391_v11 = vld [vmem:[%s2083_s3 + $0x54] ss:$8 sps:$4 sm:$0xff]   ;;  %v1393_v12 = vld [vmem:[%s2083_s3 + $0x50] ss:$8 sps:$4 sm:$0xff]   ;;  %v1394_v15 = vld [vmem:[%s2083_s3 + $0x64] ss:$8 sps:$4 sm:$0xff]  }
  0x71   :  { %v1417_v13 = vld [vmem:[#allocation7 + $0x4] ss:$8 sps:$4 sm:$0xff]   ;;  %v1420_v14 = vld [vmem:[#allocation7] ss:$8 sps:$4 sm:$0xff]   ;;  %v1423_v16 = vld [vmem:[#allocation7 + $0x14] ss:$8 sps:$4 sm:$0xff]  }
  0x72   :  { %398 = vmatpush1.bf16.msra.mxu1 %v1381_v4  ;;  %183 = vmatprep.subr.bf16.mxu0 %v1417_v13  ;;  %v1426_v17 = vld [vmem:[#allocation7 + $0x10] ss:$8 sps:$4 sm:$0xff]   ;;  %v1397_v19 = vld [vmem:[%s2083_s3 + $0x74] ss:$8 sps:$4 sm:$0xff]   ;;  %v1400_v27 = vld [vmem:[%s2083_s3 + $0x84] ss:$8 sps:$4 sm:$0xff]  }
  0x73   :  { %399 = vmatprep.subr.bf16.mxu1 %v1382_v5  ;;  %184 = vmatpush1.bf16.msra.mxu0 %v1420_v14  ;;  %v1396_v18 = vld [vmem:[%s2083_s3 + $0x60] ss:$8 sps:$4 sm:$0xff]   ;;  %v1432_v24 = vld [vmem:[#allocation10 + $0x4] ss:$8 sps:$4 sm:$0xff]   ;;  %vm871_vm1 = vcmask 60416   ;;  %vm894_vm2 = vcmask 1043456  }
  0x74   :  { %185 = vmatprep.subr.bf16.mxu0 %v1423_v16  ;;  %v1892_v20 = vld [vmem:[%s2081_s1] sm:$0x3]  ;;  %v1430_v23 = vld [vmem:[#allocation10] ss:$8 sps:$4 sm:$0xff]   ;;  %v1433_v28 = vld [vmem:[#allocation10 + $0x10] ss:$8 sps:$4 sm:$0xff]  }
  0x75   :  { %v1894_v21 = vld.sshfl [vmem:[#allocation2] sm:$0x33 pattern:$0x76325410]  ;;  %v1399_v25 = vld [vmem:[%s2083_s3 + $0x70] ss:$8 sps:$4 sm:$0xff]  }
  0x76   :  { %400 = vmatpush1.bf16.msra.mxu1 %v1384_v6  ;;  %v1898_v22 = vcombine.high %v1894_v21, %v1894_v21  ;;  %v1435_v26 = vld [vmem:[#allocation10 + $0x14] ss:$8 sps:$4 sm:$0xff]   ;;  %v1438_v30 = vld [vmem:[#allocation10 + $0x24] ss:$8 sps:$4 sm:$0xff]   ;;  %v1436_v32 = vld [vmem:[#allocation10 + $0x20] ss:$8 sps:$4 sm:$0xff]  }
  0x77   :  { %401 = vmatprep.subr.bf16.mxu1 %v1385_v7  ;;  %186 = vmatpush1.bf16.msra.mxu0 %v1426_v17  ;;  %v1402_v29 = vld [vmem:[%s2083_s3 + $0x80] ss:$8 sps:$4 sm:$0xff]   ;;  %v1403_v31 = vld [vmem:[%s2083_s3 + $0x94] ss:$8 sps:$4 sm:$0xff]   ;;  %v1405_v33 = vld [vmem:[%s2083_s3 + $0x90] ss:$8 sps:$4 sm:$0xff]  }
  0x78   :  { %427 = vmatprep.mubr.bf16.mxu1 %v1898_v22  ;;  %658 = vmatprep.subr.bf16.mxu0 %v1432_v24  ;;  %v1441_v34 = vld [vmem:[#allocation10 + $0x34] ss:$8 sps:$4 sm:$0xff]   ;;  %v1439_v36 = vld [vmem:[#allocation10 + $0x30] ss:$8 sps:$4 sm:$0xff]   ;;  %v1444_v38 = vld [vmem:[#allocation10 + $0x44] ss:$8 sps:$4 sm:$0xff]  }
  0x79   :  { %v1406_v35 = vld [vmem:[%s2083_s3 + $0xa4] ss:$8 sps:$4 sm:$0xff]   ;;  %v1408_v37 = vld [vmem:[%s2083_s3 + $0xa0] ss:$8 sps:$4 sm:$0xff]   ;;  %v1409_v39 = vld [vmem:[%s2083_s3 + $0xb4] ss:$8 sps:$4 sm:$0xff]  }
  0x7a   :  { %402 = vmatpush1.bf16.msra.mxu1 %v1387_v8  ;;  %1203 = vmatmul.mubr.msk.bf16.vlgmr.msra.gmra.mrb[0].mxu0 %vm179_vm0, %v1892_v20  ;;  %v1411_v40 = vld [vmem:[%s2083_s3 + $0xb0] ss:$8 sps:$4 sm:$0xff]   ;;  %v1412_v42 = vld [vmem:[%s2083_s3 + $0xc4] ss:$8 sps:$4 sm:$0xff]   ;;  %v1414_v45 = vld [vmem:[%s2083_s3 + $0xc0] ss:$8 sps:$4 sm:$0xff]  }
  0x7b   :  { %403 = vmatprep.subr.bf16.mxu1 %v1388_v9  ;;  %659 = vmatpush1.bf16.msra.mxu0 %v1430_v23  ;;  %v1442_v41 = vld [vmem:[#allocation10 + $0x40] ss:$8 sps:$4 sm:$0xff]   ;;  %v1447_v43 = vld [vmem:[#allocation10 + $0x54] ss:$8 sps:$4 sm:$0xff]   ;;  %v1445_v44 = vld [vmem:[#allocation10 + $0x50] ss:$8 sps:$4 sm:$0xff]  }
  0x7c   :  { %660 = vmatprep.subr.bf16.mxu0 %v1435_v26  ;;  %v1450_v46 = vld [vmem:[#allocation10 + $0x64] ss:$8 sps:$4 sm:$0xff]   ;;  %v1448_v48 = vld [vmem:[#allocation10 + $0x60] ss:$8 sps:$4 sm:$0xff]   ;;  %v1453_v50 = vld [vmem:[#allocation10 + $0x74] ss:$8 sps:$4 sm:$0xff]  }
  0x7d   :  { %v1415_v47 = vld [vmem:[%s2083_s3 + $0xd4] ss:$8 sps:$4 sm:$0xff]   ;;  %v1419_v49 = vld [vmem:[%s2083_s3 + $0xd0] ss:$8 sps:$4 sm:$0xff]   ;;  %v1421_v51 = vld [vmem:[%s2083_s3 + $0xe4] ss:$8 sps:$4 sm:$0xff]  }
  0x7e   :  { %404 = vmatpush1.bf16.msra.mxu1 %v1390_v10  ;;  %v1451_v52 = vld [vmem:[#allocation10 + $0x70] ss:$8 sps:$4 sm:$0xff]   ;;  %v1456_v54 = vld [vmem:[#allocation10 + $0x84] ss:$8 sps:$4 sm:$0xff]   ;;  %v1454_v56 = vld [vmem:[#allocation10 + $0x80] ss:$8 sps:$4 sm:$0xff]  }
  0x7f   :  { %405 = vmatprep.subr.bf16.mxu1 %v1391_v11  ;;  %661 = vmatpush1.bf16.msra.mxu0 %v1433_v28  ;;  %v1425_v53 = vld [vmem:[%s2083_s3 + $0xe0] ss:$8 sps:$4 sm:$0xff]   ;;  %v1427_v55 = vld [vmem:[%s2083_s3 + $0xf4] ss:$8 sps:$4 sm:$0xff]   ;;  %v1429_v57 = vld [vmem:[%s2083_s3 + $0xf0] ss:$8 sps:$4 sm:$0xff]   ;;  %v438_v28 = vlaneseq }
  0x80   :  { %662 = vmatprep.subr.bf16.mxu0 %v1438_v30  ;;  %v1459_v58 = vld [vmem:[#allocation10 + $0x94] ss:$8 sps:$4 sm:$0xff]   ;;  %v1457_v59 = vld [vmem:[#allocation10 + $0x90] ss:$8 sps:$4 sm:$0xff]   ;;  %v1462_v60 = vld [vmem:[#allocation10 + $0xa4] ss:$8 sps:$4 sm:$0xff]  }
  0x81   :  { %v1460_v61 = vld [vmem:[#allocation10 + $0xa0] ss:$8 sps:$4 sm:$0xff]   ;;  %v1465_v62 = vld [vmem:[#allocation10 + $0xb4] ss:$8 sps:$4 sm:$0xff]   ;;  %v1463_v63 = vld [vmem:[#allocation10 + $0xb0] ss:$8 sps:$4 sm:$0xff]  }
  0x82   :  { %406 = vmatpush1.bf16.msra.mxu1 %v1393_v12  ;;  %v1468_v1 = vld [vmem:[#allocation10 + $0xc4] ss:$8 sps:$4 sm:$0xff]   ;;  %v1466_v2 = vld [vmem:[#allocation10 + $0xc0] ss:$8 sps:$4 sm:$0xff]   ;;  %v1469_v3 = vld [vmem:[#allocation10 + $0xd0] ss:$8 sps:$4 sm:$0xff]  }
  0x83   :  { %407 = vmatprep.subr.bf16.mxu1 %v1394_v15  ;;  %663 = vmatpush1.bf16.msra.mxu0 %v1436_v32  ;;  %v1471_v4 = vld [vmem:[#allocation10 + $0xd4] ss:$8 sps:$4 sm:$0xff]   ;;  %v1474_v5 = vld [vmem:[#allocation10 + $0xe4] ss:$8 sps:$4 sm:$0xff]   ;;  %v1472_v6 = vld [vmem:[#allocation10 + $0xe0] ss:$8 sps:$4 sm:$0xff]  }
  0x84   :  { %664 = vmatprep.subr.bf16.mxu0 %v1441_v34  ;;  %v1477_v7 = vld [vmem:[#allocation10 + $0xf4] ss:$8 sps:$4 sm:$0xff]   ;;  %v1475_v8 = vld [vmem:[#allocation10 + $0xf0] ss:$8 sps:$4 sm:$0xff]   ;;  %v1482_v13 = vld [vmem:[%s2088_s8 + $0x50] sm:$0xff]   ;;  %vm890_vm3 = vcmask 64512  }
  0x85   :  { %v1478_v9 = vld [vmem:[%s2088_s8 + $0x40] sm:$0xff]   ;;  %v1480_v11 = vld [vmem:[%s2088_s8 + $0x48] sm:$0xff]   ;;  %v1483_v14 = vld [vmem:[%s2088_s8 + $0x10] sm:$0xff]   ;;  %vm1692_vm4 = vmmov 0   ;;  %s1693_s4 = smov [#allocation13]   ;;  %vm1179_vm5 = vcmask 257024  }
  0x86   :  { %408 = vmatpush1.bf16.msra.mxu1 %v1396_v18  ;;  %v1479_v10 = vld [vmem:[%s2088_s8] sm:$0xff]   ;;  %v1481_v12 = vld [vmem:[%s2088_s8 + $0x8] sm:$0xff]   ;;  %v1484_v15 = vld [vmem:[%s2088_s8 + $0x58] sm:$0xff]   ;;  %s1187_s1 = sshll.u32 %s1693_s4, 4  ;;  %s1188_s1 = int_to_ptr.vmem [resolvable:$true] %s1187_s1 }
  0x87   :  { %409 = vmatprep.subr.bf16.mxu1 %v1397_v19  ;;  %665 = vmatpush1.bf16.msra.mxu0 %v1439_v36  ;;  %v1485_v16 = vld [vmem:[%s2088_s8 + $0x18] sm:$0xff]   ;;  %v1486_v17 = vld [vmem:[%s2088_s8 + $0x60] sm:$0xff]   ;;  %v1488_v19 = vld [vmem:[%s2088_s8 + $0x68] sm:$0xff]   ;;  %s1650_s18 = scalar_lea.vmem %s1188_s1, 64  ;;  %p1655_p7 = scmp.lt.s32.totalorder %s1188_s1, %s1188_s1 }
  0x88   :  { %666 = vmatprep.subr.bf16.mxu0 %v1444_v38  ;;  %v1487_v18 = vld [vmem:[%s2088_s8 + $0x20] sm:$0xff]   ;;  %v1489_v23 = vld [vmem:[%s2088_s8 + $0x28] sm:$0xff]   ;;  %p1651_p6 = scmp.ne.s32.totalorder %s1188_s1, %s1650_s18  ;;  %p1656_p8 = scmp.lt.s32.totalorder %s1650_s18, %s1650_s18 }
  0x8a   :  { %410 = vmatpush1.bf16.msra.mxu1 %v1399_v25  ;;  %p1657_p9 = por %p1656_p8, %p1655_p7 }
  0x8b   :  { %411 = vmatprep.subr.bf16.mxu1 %v1400_v27  ;;  %667 = vmatpush1.bf16.msra.mxu0 %v1442_v41 }
  0x8c   :  { %668 = vmatprep.subr.bf16.mxu0 %v1447_v43  ;;  %p1658_p10 = pnand %p1657_p9, %p1651_p6 }
  0x8e   :  { %412 = vmatpush1.bf16.msra.mxu1 %v1402_v29  ;;  %v439_v29 = vshrl.u32 %v438_v28, 7  ;;  %v1499_v28 = vld [vmem:[%s2091_s11 + $0x8] sm:$0xff]  }
  0x8f   :  { %413 = vmatprep.subr.bf16.mxu1 %v1403_v31  ;;  %669 = vmatpush1.bf16.msra.mxu0 %v1445_v44  ;;  %v436_v31 = vld [vmem:[#allocation8] sm:$0x3] }
  0x90   :  { %670 = vmatprep.subr.bf16.mxu0 %v1450_v46  ;;  %v440_v30 = vsub.s32 0, %v439_v29  ;;  %v444_v32 = vsub.s32 1, %v439_v29  ;;  %v1500_v29 = vld [vmem:[%s2091_s11 + $0x50] sm:$0xff]  }
  0x92   :  { %414 = vmatpush1.bf16.msra.mxu1 %v1405_v33  ;;  %v441_v33 = vrot.slane %v436_v31, %v440_v30 }
  0x93   :  { %415 = vmatprep.subr.bf16.mxu1 %v1406_v35  ;;  %671 = vmatpush1.bf16.msra.mxu0 %v1448_v48  ;;  %v445_v35 = vrot.slane %v436_v31, %v444_v32  ;;  %v1491_v48 = vld [vmem:[%s2088_s8 + $0x30] sm:$0xff]   ;;  %v1502_v31 = vld [vmem:[%s2091_s11 + $0x58] sm:$0xff]  }
  0x94   :  { %672 = vmatprep.subr.bf16.mxu0 %v1453_v50  ;;  %v1493_v50 = vld [vmem:[%s2088_s8 + $0x38] sm:$0xff]  }
  0x96   :  { %416 = vmatpush1.bf16.msra.mxu1 %v1408_v37 }
  0x97   :  { %417 = vmatprep.subr.bf16.mxu1 %v1409_v39  ;;  %673 = vmatpush1.bf16.msra.mxu0 %v1451_v52 }
  0x98   :  { %674 = vmatprep.subr.bf16.mxu0 %v1456_v54 }
  0x9a   :  { %418 = vmatpush1.bf16.msra.mxu1 %v1411_v40 }
  0x9b   :  { %419 = vmatprep.subr.bf16.mxu1 %v1412_v42  ;;  %675 = vmatpush1.bf16.msra.mxu0 %v1454_v56 }
  0x9c   :  { %676 = vmatprep.subr.bf16.mxu0 %v1459_v58 }
  0x9e   :  { %420 = vmatpush1.bf16.msra.mxu1 %v1414_v45 }
  0x9f   :  { %421 = vmatprep.subr.bf16.mxu1 %v1415_v47  ;;  %677 = vmatpush1.bf16.msra.mxu0 %v1457_v59  ;;  %v1490_v47 = vld [vmem:[%s2088_s8 + $0x70] sm:$0xff]  }
  0xa0   :  { %678 = vmatprep.subr.bf16.mxu0 %v1462_v60 }
  0xa2   :  { %422 = vmatpush1.bf16.msra.mxu1 %v1419_v49  ;;  %v1492_v49 = vld [vmem:[%s2088_s8 + $0x78] sm:$0xff]  }
  0xa3   :  { %423 = vmatprep.subr.bf16.mxu1 %v1421_v51  ;;  %679 = vmatpush1.bf16.msra.mxu0 %v1460_v61 }
  0xa4   :  { %680 = vmatprep.subr.bf16.mxu0 %v1465_v62 }
  0xa6   :  { %424 = vmatpush1.bf16.msra.mxu1 %v1425_v53 }
  0xa7   :  { %425 = vmatprep.subr.bf16.mxu1 %v1427_v55  ;;  %681 = vmatpush1.bf16.msra.mxu0 %v1463_v63 }
  0xa8   :  { %682 = vmatprep.subr.bf16.mxu0 %v1468_v1 }
  0xaa   :  { %426 = vmatpush1.bf16.msra.mxu1 %v1429_v57 }
  0xab   :  { %683 = vmatpush1.bf16.msra.mxu0 %v1466_v2  ;;  %1309 = vmatprep.subr.bf16.mxu1 %v1478_v9  ;;  %v122_v2 = vld [vmem:[#allocation5] sm:$0xf] }
  0xac   :  { %684 = vmatprep.subr.bf16.mxu0 %v1471_v4 }
  0xad   :  { %428 = vmatmul.mubr.bf16.vlgmr.msra.gmra.mrb[0].mxu1 %v1894_v21 }
  0xae   :  { %1310 = vmatpush3.bf16.msra.mxu1 %v1479_v10 }
  0xaf   :  { %685 = vmatpush1.bf16.msra.mxu0 %v1469_v3  ;;  %1311 = vmatprep.subr.bf16.mxu1 %v1480_v11 }
  0xb0   :  { %686 = vmatprep.subr.bf16.mxu0 %v1474_v5 }
  0xb2   :  { %1312 = vmatpush3.bf16.msra.mxu1 %v1481_v12 }
  0xb3   :  { %687 = vmatpush1.bf16.msra.mxu0 %v1472_v6  ;;  %1313 = vmatprep.subr.bf16.mxu1 %v1482_v13  ;;  %v884_v13 = vld [vmem:[%s2089_s9] sm:$0xff] }
  0xb4   :  { %688 = vmatprep.subr.bf16.mxu0 %v1477_v7 }
  0xb6   :  { %1314 = vmatpush3.bf16.msra.mxu1 %v1483_v14  ;;  %v1286_v14 = vcombine.high %v884_v13, %v884_v13 }
  0xb7   :  { %689 = vmatpush1.bf16.msra.mxu0 %v1475_v8  ;;  %1315 = vmatprep.subr.bf16.mxu1 %v1484_v15  ;;  %v1285_v15 = vcombine.low %v884_v13, %v884_v13 }
  0xb8   :  { %1287 = vmatprep.subr.msk.bf16.mxu0 %vm894_vm2, %v1286_v14 }
  0xba   :  { %1316 = vmatpush3.bf16.msra.mxu1 %v1485_v16  ;;  %v896_v16 = vsel %vm894_vm2, %v1285_v15, 0 }
  0xbb   :  { %1317 = vmatprep.subr.bf16.mxu1 %v1486_v17  ;;  %v1496_v17 = vld [vmem:[%s2091_s11 + $0x40] sm:$0xff]  }
  0xbe   :  { %1318 = vmatpush3.bf16.msra.mxu1 %v1487_v18  ;;  %v1691_v18 = vmov 0.0  }
  0xbf   :  { %1319 = vmatprep.subr.bf16.mxu1 %v1488_v19 }
  0xc2   :  { %1320 = vmatpush3.bf16.msra.mxu1 %v1489_v23 }
  0xc3   :  { %1321 = vmatprep.subr.bf16.mxu1 %v1490_v47 }
  0xc6   :  { %1322 = vmatpush3.bf16.msra.mxu1 %v1491_v48 }
  0xc7   :  { %1323 = vmatprep.subr.bf16.mxu1 %v1492_v49 }
  0xca   :  { %1324 = vmatpush3.bf16.msra.mxu1 %v1493_v50 }
  0xcb   :  { %1356 = vmatprep.subr.bf16.mxu1 %v1691_v18 }
 0x14d   :  { %v217_v24 = vpop.f32.mrb[0].mxu0 }
 0x14e   :  { %v219_v25 = vpop.f32.mrb[1].mxu0 }
 0x14f   :  { %v221_v26 = vpop.f32.mrb[2].mxu0 }
 0x150   :  { %v222_v27 = vpop.f32.mrb[3].mxu0 }
 0x151   :  { %v1498_v27 = vld [vmem:[%s2091_s11 + $0x48] sm:$0xff]  }
 0x180   :  { %v429_v34 = vpop.f32.mrb[0].mxu1 }
 0x181   :  { %v430_v36 = vadd.f32 %v429_v34, %v217_v24  ;;  %v431_v37 = vpop.f32.mrb[1].mxu1  ;;  %v1505_v34 = vld [vmem:[%s2091_s11 + $0x20] sm:$0xff]  }
 0x182   :  { %v432_v38 = vadd.f32 %v431_v37, %v219_v25  ;;  %v433_v39 = vpop.f32.mrb[2].mxu1  ;;  %v1497_v25 = vld [vmem:[%s2091_s11] sm:$0xff]   ;;  %v1508_v37 = vld [vmem:[%s2091_s11 + $0x70] sm:$0xff]  }
 0x183   :  { %v448_v40 = vadd.f32 %v441_v33, %v430_v36  ;;  %v434_v41 = vpop.f32.mrb[3].mxu1  ;;  %v1504_v33 = vld [vmem:[%s2091_s11 + $0x60] sm:$0xff]   ;;  %v1507_v36 = vld [vmem:[%s2091_s11 + $0x28] sm:$0xff]  }
 0x184   :  { %v449_v42 = vadd.f32 %v445_v35, %v432_v38  ;;  %v1506_v35 = vld [vmem:[%s2091_s11 + $0x68] sm:$0xff]   ;;  %v1509_v38 = vld [vmem:[%s2091_s11 + $0x30] sm:$0xff]   ;;  %v1510_v39 = vld [vmem:[%s2090_s10] sm:$0xff]  }
 0x185   :  { %v450_v43 = vmax.f32 %v448_v40, 0.0  ;;  %v1511_v40 = vld [vmem:[%s2091_s11 + $0x78] sm:$0xff]  }
 0x186   :  { %v451_v44 = vmax.f32 %v449_v42, 0.0  ;;  %v1512_v41 = vld [vmem:[%s2091_s11 + $0x38] sm:$0xff]   ;;  %v1513_v42 = vld [vmem:[%s2090_s10 + $0x8] sm:$0xff]  }
 0x187   :  { %v452_v46 = vpack.c.bf16 %v450_v43, %v450_v43 }
 0x188   :  { %v453_v45 = vpack.c.bf16 %v451_v44, %v451_v44 }
 0x18a   :  { %690 = vmatprep.mubr.bf16.mxu0 %v453_v45 }
 0x18b   :  { %691 = vmatmul.mubr.bf16.vlgmr.msra.gmra.mrb[4].mxu0 %v452_v46 }
 0x18c   :  { %933 = vmatprep.mubr.bf16.mxu0 %v1690_v0  ;;  %v486_v0 = vld [vmem:[#allocation11] sm:$0x3]  ;;  %902 = vmatpush1.bf16.msra.mxu0 %v896_v16 }
 0x18d   :  { %v491_v51 = vrot.slane %v486_v0, %v440_v30  ;;  %v495_v52 = vrot.slane %v486_v0, %v444_v32  ;;  %1331 = vmatprep.subr.bf16.mxu0 %v1496_v17  ;;  %v1501_v30 = vld [vmem:[%s2091_s11 + $0x10] sm:$0xff]   ;;  %v1503_v32 = vld [vmem:[%s2091_s11 + $0x18] sm:$0xff]  }
 0x25e   :  { %v692_v53 = vpop.f32.mrb[4].mxu0 }
 0x25f   :  { %v693_v54 = vadd.f32 %v692_v53, %v491_v51  ;;  %v694_v55 = vpop.f32.mrb[5].mxu0 }
 0x260   :  { %v695_v56 = vadd.f32 %v694_v55, %v495_v52  ;;  %v696_v57 = vpop.f32.mrb[6].mxu0 }
 0x261   :  { %v699_v58 = vmax.f32 %v693_v54, 0.0  ;;  %v697_v59 = vpop.f32.mrb[7].mxu0  ;;  %v1308_v57 = vld [vmem:[%s2092_s12] ss:$0 sm:$0xff] }
 0x262   :  { %v700_v60 = vmax.f32 %v695_v56, 0.0 }
 0x263   :  { %v701_v62 = vpack.c.bf16 %v699_v58, %v699_v58 }
 0x264   :  { %v702_v61 = vpack.c.bf16 %v700_v60, %v700_v60 }
 0x266   :  { %863 = vmatprep.mubr.bf16.mxu1 %v702_v61 }
 0x267   :  { %864 = vmatmul.mubr.bf16.vlgmr.msra.gmra.mrb[4].mxu1 %v701_v62 }
 0x268   :  { %1357 = vmatpush3.bf16.msra.mxu1 %v1510_v39  ;;  %1360 = vmatprep.mubr.msk.bf16.mxu1 %vm1692_vm4, %v1691_v18 }
 0x269   :  { %1358 = vmatprep.subr.bf16.mxu1 %v1691_v18 }
 0x26c   :  { %1359 = vmatpush3.bf16.msra.mxu1 %v1513_v42 }
 0x26f   :  { %1361 = vmatmul.mubr.msk.bf16.vlgmr.msra.gmra.mrb[8].mxu1 %vm179_vm0, %v1892_v20 }
 0x33a   :  { %v1325_v63 = vpop.f32.mrb[4].mxu1 }
 0x33b   :  { %v1326_v1 = vpop.f32.mrb[5].mxu1 }
 0x33c   :  { %v1327_v3 = vadd.f32 %v1326_v1, %v1325_v63  ;;  %v1328_v4 = vpop.f32.mrb[6].mxu1 }
 0x33d   :  { %v1329_v5 = vpop.f32.mrb[7].mxu1 }
 0x33e   :  { %v866_v6 = vadd.f32 %v1327_v3, %v122_v2 }
 0x340   :  { %v872_v7 = vsel %vm871_vm1, %v866_v6, -inf }
 0x341   :  { %873 = vmax.xlane.f32.xlu0 %v872_v7 }
 0x342   :  { %v1164_v0 = vpop.f32.mrb[8].mxu1 }
 0x343   :  { %v1362_v51 = vpop.f32.mrb[9].mxu1 }
 0x344   :  { %v1167_v52 = vpop.f32.mrb[10].mxu1 }
 0x345   :  { %v1363_v53 = vpop.f32.mrb[11].mxu1 }
 0x3ce   :  { %v874_v8 = vpop.xlane.xlu0 %873 }
 0x3cf   :  { %v875_v9 = vsub.f32 %v866_v6, %v874_v8 }
 0x3d1   :  { %v876_v10 = vmul.f32 1.442695, %v875_v9 }
 0x3d3   :  { %1514 = vpow2.f32 %v876_v10 }
 0x3dd   :  { %v1515_v11 = vpop.eup %1514 }
 0x3de   :  { %v878_v12 = vsel %vm871_vm1, %v1515_v11, 0.0 }
 0x3df   :  { %879 = vadd.xlane.f32.xlu0 %v878_v12 }
 0x46c   :  { %v880_v19 = vpop.xlane.xlu0 %879 }
 0x46d   :  { %1516 = vrcp.f32 %v880_v19 }
 0x477   :  { %v1517_v23 = vpop.eup %1516 }
 0x478   :  { %v882_v24 = vmul.f32 %v1517_v23, %v1515_v11 }
 0x47a   :  { %v883_v26 = vpack.c.bf16 %v882_v24, %v882_v24 }
 0x47c   :  { %1288 = vmatmul.mubr.msk.bf16.vlgmr.msra.gmra.mrb[8].mxu0 %vm890_vm3, %v883_v26 }
 0x47d   :  { %1332 = vmatpush3.bf16.msra.mxu0 %v1497_v25 }
 0x47e   :  { %1333 = vmatprep.subr.bf16.mxu0 %v1498_v27 }
 0x481   :  { %1334 = vmatpush3.bf16.msra.mxu0 %v1499_v28 }
 0x482   :  { %1335 = vmatprep.subr.bf16.mxu0 %v1500_v29 }
 0x485   :  { %1336 = vmatpush3.bf16.msra.mxu0 %v1501_v30 }
 0x486   :  { %1337 = vmatprep.subr.bf16.mxu0 %v1502_v31 }
 0x489   :  { %1338 = vmatpush3.bf16.msra.mxu0 %v1503_v32 }
 0x48a   :  { %1339 = vmatprep.subr.bf16.mxu0 %v1504_v33 }
 0x48d   :  { %1340 = vmatpush3.bf16.msra.mxu0 %v1505_v34 }
 0x48e   :  { %1341 = vmatprep.subr.bf16.mxu0 %v1506_v35 }
 0x491   :  { %1342 = vmatpush3.bf16.msra.mxu0 %v1507_v36 }
 0x492   :  { %1343 = vmatprep.subr.bf16.mxu0 %v1508_v37 }
 0x495   :  { %1344 = vmatpush3.bf16.msra.mxu0 %v1509_v38 }
 0x496   :  { %1345 = vmatprep.subr.bf16.mxu0 %v1511_v40 }
 0x499   :  { %1346 = vmatpush3.bf16.msra.mxu0 %v1512_v41 }
 0x54f   :  { %v935_v43 = vpop.f32.mrb[8].mxu0 }
 0x550   :  { %v942_v44 = vpack.c.bf16 %v935_v43, %v935_v43  ;;  %v937_v45 = vpop.f32.mrb[9].mxu0 }
 0x551   :  { %v943_v46 = vpack.c.bf16 %v937_v45, %v937_v45  ;;  %v939_v47 = vpop.f32.mrb[10].mxu0 }
 0x552   :  { %v940_v48 = vpop.f32.mrb[11].mxu0  ;;  %v944_v50 = vmul.bf16 %v1894_v21, %v942_v44 }
 0x553   :  { %v945_v49 = vmul.bf16 %v943_v46, %v1898_v22 }
 0x555   :  { %1110 = vmatprep.mubr.bf16.mxu0 %v945_v49 }
 0x556   :  { %1111 = vmatmul.mubr.bf16.vlgmr.msra.gmra.mrb[12].mxu0 %v944_v50 }
 0x629   :  { %v1347_v54 = vpop.f32.mrb[12].mxu0 }
 0x62a   :  { %v1348_v55 = vpop.f32.mrb[13].mxu0 }
 0x62b   :  { %v1349_v56 = vadd.f32 %v1348_v55, %v1347_v54  ;;  %v1350_v20 = vpop.f32.mrb[14].mxu0 }
 0x62c   :  { %v1351_v58 = vpop.f32.mrb[15].mxu0 }
 0x62d   :  { %v1165_v59 = vadd.f32 %v1349_v56, %v1164_v0 }
 0x62f   :  { %v1177_v22 = vadd.f32 %v1308_v57, %v1165_v59 }
 0x631   :  { %v1178_v21 = vmax.f32 %v1177_v22, 0.0 }
 0x633   :  { %1180 = vst.msk [vmem:[#allocation13] sm:$0xf] %vm1179_vm5, %v1178_v21 }
 0x634   :  { %1661 = shalt.err (!%p1658_p10)
}
 0x635   :  { %s1662_s12 = scalar_lea.hbm %s2093_s13, 64 }
 0x636   :  { %p1663_p11 = scmp.ne.s32.totalorder %s2093_s13, %s1662_s12  ;;  %p1666_p12 = scmp.lt.u32.totalorder %s1662_s12, %s2093_s13 }
 0x638   :  { %p1668_p13 = pnand %p1666_p12, %p1663_p11 }
 0x63a   :  { %1671 = shalt.err (!%p1668_p13)
}
 0x63b   :  { %1190 = dma.vmem_to_hbm [thread:$0]  %s1188_s1, 64, %s2093_s13, [#allocation4]  }
 0x63c   :  { %1680 = dma.done.wait [#allocation4], 64  }
 0x63d   :  { %1681 = vsyncadd [#allocation4], 4294967232 }
 0x63e   :  { %1194 = vsyncpa [#allocation3], 1 }
 0x63f   :  { %1195 = vsyncpa [#allocation6], 1 }
 0x640   :  { %1196 = vsyncpa [#allocation9], 1 }
 0x641   :  { %1197 = vsyncpa [#allocation12], 1 }
 0x642   :  { %1198 = vsyncpa [#allocation4], 1 }

</bundles_post_ra>
